<compile_context>
chip_gen: v7x
topology: tpu7x:2x2x1
jax: 0.10.0
libtpu: 0.0.40
codegen_flags: <defaults>
</compile_context>

<pallas_src>
import functools

import jax
import jax.numpy as jnp
from jax.experimental import pallas as pl
from jax.experimental.pallas import tpu as pltpu


def _ceil_div(a, b):
    return -(-a // b)


def _row_sqerr_kernel(pred_ref, gt_ref, out_ref, *, scale):
    # pred_ref / gt_ref: (tm, tn) tiles; out_ref: (tm, 128) f32 (lane-dense).
    d = pred_ref[...].astype(jnp.float32) - gt_ref[...].astype(jnp.float32)
    partial = scale * jnp.sum(d * d, axis=1, keepdims=True)      # (tm, 1)
    # Broadcast across the 128 lanes -> full unmasked vector stores; the glue
    # reads lane 0 of each chunk column.
    out_ref[...] = jnp.broadcast_to(partial, out_ref.shape)


def _pick_tiles(rows, hw, itemsize, *, target_steps=8):
    """Choose (tm, tn): row tile and H*W chunk size.

    Policy (memory-bound streaming):
      * ~1-2 MiB per input block reaches the HBM roofline; bigger buys nothing,
      * aim for >= target_steps total grid steps (>= 4 per core on v7x),
      * tn must divide hw exactly (reduced axis: no ragged chunks) and be a
        multiple of 128 unless tn == hw,
      * tm is a multiple of 32 (>=32), of 8 (>=8), or == rows (always legal).
    """
    TARGET_BLOCK = 2 * 1024 * 1024     # ~2 MiB per input block
    MIN_BLOCK = 512 * 1024             # don't shrink below ~0.5 MiB just for steps

    def round_tm(t):
        t = int(t)
        if t >= rows:
            return rows
        if t >= 32:
            return t - (t % 32)
        if t >= 8:
            return t - (t % 8)
        return rows if rows < 8 else 8

    row_bytes = hw * itemsize

    # 1) ~TARGET_BLOCK-sized row blocks against the full hw width.
    tm = round_tm(max(1, TARGET_BLOCK // row_bytes))

    # 2) Prefer more row blocks (down to MIN_BLOCK-sized blocks) before
    #    splitting hw: row splitting adds steps without extra output columns.
    if _ceil_div(rows, tm) < target_steps:
        tm_floor = round_tm(max(1, MIN_BLOCK // row_bytes))
        tm_steps = round_tm(max(1, _ceil_div(rows, target_steps)))
        tm_new = max(tm_floor, tm_steps)
        if tm_new < tm:
            tm = tm_new

    n_row_blocks = _ceil_div(rows, tm)

    # 3) Small B*J: split hw into equal multiple-of-128 chunks so the second
    #    TensorCore (v7x) and the DMA pipeline still get parallel steps.
    tn = hw
    if n_row_blocks < target_steps and hw % 128 == 0 and hw > 128:
        m = hw // 128
        best_k = 1
        for k in range(2, m + 1):
            if m % k:
                continue
            if tm * (hw // k) * itemsize < MIN_BLOCK // 2:
                break                  # chunks too small to amortize per-step cost
            best_k = k
            if n_row_blocks * k >= target_steps:
                break
        tn = hw // best_k

    return int(tm), int(tn)


def _per_joint_loss_pallas(pred, gt, *, tm=None, tn=None):
    """pred/gt: (rows, hw). Returns (rows,) f32 = 0.5*mean_pixels((pred-gt)^2)."""
    rows, hw = pred.shape
    itemsize = jnp.dtype(pred.dtype).itemsize

    auto_tm, auto_tn = _pick_tiles(rows, hw, itemsize)
    tm = auto_tm if tm is None else int(tm)
    tn = auto_tn if tn is None else int(tn)

    assert hw % tn == 0, "hw chunk must divide H*W exactly (reduced axis)"
    assert tn == hw or tn % 128 == 0, "hw chunk must be lane-aligned (x128)"
    assert tm == rows or tm % 8 == 0, "row tile must be sublane-aligned (x8)"

    n_row_blocks = _ceil_div(rows, tm)
    n_chunks = hw // tn
    rows_pad = n_row_blocks * tm       # padded output; garbage tail sliced below

    # Scoped VMEM = actual working set (2 inputs x 2 buffers + 2 output buffers)
    # plus headroom; no oversized floor (v7x has only 64 MiB physical VMEM).
    in_block = tm * tn * itemsize
    out_block = tm * 128 * 4
    needed = 2 * 2 * in_block + 2 * out_block
    vmem_limit = int(max(needed + 4 * 1024 * 1024, 16 * 1024 * 1024))

    # Advisory cost estimate so XLA schedules around a mem-bound custom call.
    cost = pl.CostEstimate(
        flops=3 * rows * hw,
        transcendentals=0,
        bytes_accessed=2 * rows * hw * itemsize + rows_pad * n_chunks * 128 * 4,
    )

    # Default double-buffering kept deliberately: with ~1-2 MiB blocks and
    # >= 8 grid steps per-step DMA latency is hidden, and depth 2 is the
    # v7x-safe (64 MiB VMEM) choice.
    out = pl.pallas_call(
        functools.partial(_row_sqerr_kernel, scale=0.5 / hw),
        out_shape=jax.ShapeDtypeStruct((rows_pad, n_chunks * 128), jnp.float32),
        grid_spec=pltpu.PrefetchScalarGridSpec(
            num_scalar_prefetch=0,
            grid=(n_row_blocks, n_chunks),
            in_specs=[
                pl.BlockSpec((tm, tn), lambda i, j: (i, j)),
                pl.BlockSpec((tm, tn), lambda i, j: (i, j)),
            ],
            out_specs=pl.BlockSpec((tm, 128), lambda i, j: (i, j)),
        ),
        compiler_params=pltpu.CompilerParams(
            dimension_semantics=("parallel", "parallel"),
            vmem_limit_bytes=vmem_limit,
        ),
        cost_estimate=cost,
    )(pred, gt)

    # Lane 0 of each 128-lane column block holds that chunk's partial sum.
    # Slice off padded garbage rows BEFORE any reduction (ragged last block).
    partial = out[:rows, ::128]                    # (rows, n_chunks)
    return jnp.sum(partial, axis=1)


def joints_ohkm_mse_loss(output, target, target_weight, *,
                         use_target_weight=True, topk=8,
                         tm=None, tn=None, use_pallas=None,
                         min_pallas_bytes=4 * 1024 * 1024):
    """output/target: (B, J, H, W); target_weight: (B, J, 1). Returns scalar."""
    B, J, H, W = output.shape
    assert topk <= J, f"topk={topk} must be <= num_joints={J}"
    hw = H * W
    rows = B * J

    # Contiguous NCHW -> (B*J, H*W): metadata reshape, no HBM copy.
    pred = output.reshape(rows, hw)
    gt = target.reshape(rows, hw)
    itemsize = jnp.dtype(output.dtype).itemsize

    if use_pallas is None:
        # Tiny inputs: pallas_call fixed overhead dominates; plain XLA is fine.
        use_pallas = rows * hw * itemsize >= min_pallas_bytes

    if use_pallas:
        per_joint = _per_joint_loss_pallas(pred, gt, tm=tm, tn=tn)
    else:
        d = pred.astype(jnp.float32) - gt.astype(jnp.float32)
        per_joint = 0.5 * jnp.mean(d * d, axis=1)

    if use_target_weight:
        # w is constant across pixels -> fold as w^2 on the tiny (B*J,) vector.
        w = target_weight.reshape(rows).astype(jnp.float32)
        per_joint = per_joint * (w * w)

    loss_mat = per_joint.reshape(B, J)

    # OHKM: top-k over joints per batch element (tiny, plain JAX).
    topk_val, _ = jax.lax.top_k(loss_mat, topk)
    return jnp.mean(jnp.sum(topk_val, axis=1) / topk)


def _reference(output, target, target_weight, use_target_weight=True, topk=8):
    # Exact PyTorch-order reference: (w*pred - w*gt)^2, mean, 0.5, top-k.
    B, J, H, W = output.shape
    pred = output.reshape(B, J, -1).astype(jnp.float32)
    gt = target.reshape(B, J, -1).astype(jnp.float32)
    if use_target_weight:
        w = target_weight.reshape(B, J, 1).astype(jnp.float32)
        pred = pred * w
        gt = gt * w
    loss = 0.5 * jnp.mean((pred - gt) ** 2, axis=2)            # (B, J)
    topk_val, _ = jax.lax.top_k(loss, topk)
    return jnp.mean(jnp.sum(topk_val, axis=1) / topk)


if __name__ == "__main__":
    # Module "parameters": use_target_weight flag and topk (deterministic).
    USE_TARGET_WEIGHT = True
    TOPK = 8

    key = jax.random.PRNGKey(0)
    k1, k2, k3 = jax.random.split(key, 3)

    # Case 1: small canonical shape, Pallas path forced (auto tiles, 1 chunk).
    B, J, H, W = 2, 16, 16, 16                     # num_joints >= topk
    output = jax.random.normal(k1, (B, J, H, W), dtype=jnp.float32)
    target = jax.random.normal(k2, (B, J, H, W), dtype=jnp.float32)
    target_weight = jax.random.uniform(k3, (B, J, 1), dtype=jnp.float32)

    loss = jax.block_until_ready(
        joints_ohkm_mse_loss(output, target, target_weight,
                             use_target_weight=USE_TARGET_WEIGHT, topk=TOPK,
                             use_pallas=True))
    ref = _reference(output, target, target_weight, USE_TARGET_WEIGHT, TOPK)
    assert jnp.allclose(loss, ref, rtol=1e-5, atol=1e-6), (loss, ref)

    # Case 2: ragged rows (B*J = 51) with forced 2-D tiling (tm=16, tn=128):
    # exercises the cdiv grid, the ragged last row-block, the multi-chunk
    # partial-sum columns and the padded-output slicing.
    B2, J2 = 3, 17
    o2 = jax.random.normal(k1, (B2, J2, H, W), dtype=jnp.float32)
    t2 = jax.random.normal(k2, (B2, J2, H, W), dtype=jnp.float32)
    tw2 = jax.random.uniform(k3, (B2, J2, 1), dtype=jnp.float32)
    loss2 = jax.block_until_ready(
        joints_ohkm_mse_loss(o2, t2, tw2, use_target_weight=True, topk=TOPK,
                             tm=16, tn=128, use_pallas=True))
    ref2 = _reference(o2, t2, tw2, True, TOPK)
    assert jnp.allclose(loss2, ref2, rtol=1e-5, atol=1e-6), (loss2, ref2)

    # Case 3: same tiny inputs through the auto path (plain-jnp small-input
    # fallback — no pallas_call).
    loss3 = jax.block_until_ready(
        joints_ohkm_mse_loss(output, target, target_weight,
                             use_target_weight=USE_TARGET_WEIGHT, topk=TOPK))
    assert jnp.allclose(loss3, ref, rtol=1e-5, atol=1e-6), (loss3, ref)

    print("KERNEL_OK")
</pallas_src>

<mosaic_0001>
module attributes {stable_mosaic.version = 11 : i64} {
  func.func @_row_sqerr_kernel(%arg0: i32, %arg1: i32, %arg2: memref<32x256xf32, #tpu.memory_space<vmem>>, %arg3: memref<32x256xf32, #tpu.memory_space<vmem>>, %arg4: memref<32x128xf32, #tpu.memory_space<vmem>>) attributes {dimension_semantics = [#tpu.dimension_semantics<parallel>, #tpu.dimension_semantics<parallel>], iteration_bounds = array<i64: 1, 1>, scalar_prefetch = 0 : i64, scratch_operands = 0 : i64, tpu.core_type = #tpu.core_type<tc>, window_params = [{transform_indices = @transform_0, window_bounds = array<i64: 32, 256>}, {transform_indices = @transform_1, window_bounds = array<i64: 32, 256>}, {transform_indices = @transform_2, window_bounds = array<i64: 32, 128>}]} {
    %c0 = arith.constant 0 : index
    %c0_0 = arith.constant 0 : index
    %0 = vector.load %arg2[%c0, %c0_0] : memref<32x256xf32, #tpu.memory_space<vmem>>, vector<32x256xf32>
    %c0_1 = arith.constant 0 : index
    %c0_2 = arith.constant 0 : index
    %1 = vector.load %arg3[%c0_1, %c0_2] : memref<32x256xf32, #tpu.memory_space<vmem>>, vector<32x256xf32>
    %2 = arith.subf %0, %1 : vector<32x256xf32>
    %3 = arith.mulf %2, %2 : vector<32x256xf32>
    %cst = arith.constant dense<0.000000e+00> : vector<32xf32>
    %4 = vector.multi_reduction <add>, %3, %cst [1] : vector<32x256xf32> to vector<32xf32>
    %5 = vector.shape_cast %4 : vector<32xf32> to vector<32x1xf32>
    %cst_3 = arith.constant 0.001953125 : f32
    %6 = vector.broadcast %cst_3 : f32 to vector<32x1xf32>
    %7 = arith.mulf %6, %5 : vector<32x1xf32>
    %8 = vector.shape_cast %7 : vector<32x1xf32> to vector<32x1xf32>
    %9 = vector.broadcast %8 : vector<32x1xf32> to vector<32x128xf32>
    %c0_4 = arith.constant 0 : index
    %c0_5 = arith.constant 0 : index
    %10 = vector.load %arg4[%c0_4, %c0_5] : memref<32x128xf32, #tpu.memory_space<vmem>>, vector<32x128xf32>
    tpu.vector_store %arg4[%c0_4, %c0_5], %9 {strides = array<i32>} : memref<32x128xf32, #tpu.memory_space<vmem>>, vector<32x128xf32>,
    return
  }
  func.func @transform_0(%arg0: i32, %arg1: i32) -> (i32, i32) {
    %c0_i32 = arith.constant 0 : i32
    return %arg0, %arg1 : i32, i32
  }
  func.func @transform_1(%arg0: i32, %arg1: i32) -> (i32, i32) {
    %c0_i32 = arith.constant 0 : i32
    return %arg0, %arg1 : i32, i32
  }
  func.func @transform_2(%arg0: i32, %arg1: i32) -> (i32, i32) {
    %c0_i32 = arith.constant 0 : i32
    return %arg0, %arg1 : i32, i32
  }
}

</mosaic_0001>

<bundles_post_ra>
// kernel: tpu_custom_call.1
= control target key start
LH: loop header
LB: loop body
LE: loop exit
PB: predicated region body
PF: predicated region fallthrough
CT: control target
= control target key end

     0   :  { %7 = vsyncpa [#allocation3], 0  ;;  %s247_s0 = inlined_call_operand.hbm [shape: f32[32,256], index: 0, kind: input, shape index: {}]   ;;  %s248_s1 = inlined_call_operand.hbm [shape: f32[32,256], index: 1, kind: input, shape index: {}]   ;;  %s249_s2 = inlined_call_operand.hbm [shape: f32[32,128], index: 2, kind: output, shape index: {}]  }
   0x1   :  { %8 = vsyncpa [#allocation6], 0 }
   0x2   :  { %9 = vsyncpa [#allocation4], 0  ;;  %s189_s9 = smov [#allocation2]   ;;  %s117_s13 = scalar_lea.hbm %s247_s0, 1024 }
   0x3   :  { %s15_s10 = sshll.u32 %s189_s9, 4  ;;  %p118_p0 = scmp.ne.s32.totalorder %s247_s0, %s117_s13  ;;  %s16_s10 = int_to_ptr.vmem [resolvable:$true] %s15_s10 }
   0x4   :  { %p121_p1 = scmp.lt.u32.totalorder %s117_s13, %s247_s0 }
   0x6   :  { %p123_p2 = pnand %p121_p1, %p118_p0 }
   0x8   :  { %126 = shalt.err (!%p123_p2)
}
   0x9   :  { %s127_s18 = scalar_lea.vmem %s16_s10, 1024  ;;  %p132_p4 = scmp.lt.s32.totalorder %s16_s10, %s16_s10 }
   0xa   :  { %p128_p3 = scmp.ne.s32.totalorder %s16_s10, %s127_s18  ;;  %p133_p5 = scmp.lt.s32.totalorder %s127_s18, %s127_s18 }
   0xc   :  { %p134_p6 = por %p133_p5, %p132_p4 }
   0xe   :  { %p135_p7 = pnand %p134_p6, %p128_p3 }
  0x10   :  { %138 = shalt.err (!%p135_p7)
}
  0x11   :  { %s190_s19 = smov 256   ;;  %s191_s20 = smov 16  }
  0x12   :  { %21 = dma.hbm_to_vmem [thread:$0]  %s247_s0, 1024, %s16_s10, [#allocation3], %s190_s19, %s190_s19, %s191_s20  }
  0x13   :  { %s192_s23 = smov [#allocation5]   ;;  %s139_s27 = scalar_lea.hbm %s248_s1, 1024 }
  0x14   :  { %s27_s24 = sshll.u32 %s192_s23, 4  ;;  %p140_p8 = scmp.ne.s32.totalorder %s248_s1, %s139_s27  ;;  %s28_s24 = int_to_ptr.vmem [resolvable:$true] %s27_s24 }
  0x15   :  { %p143_p9 = scmp.lt.u32.totalorder %s139_s27, %s248_s1 }
  0x17   :  { %p145_p10 = pnand %p143_p9, %p140_p8 }
  0x19   :  { %148 = shalt.err (!%p145_p10)
}
  0x1a   :  { %s149_s4 = scalar_lea.vmem %s28_s24, 1024  ;;  %p154_p12 = scmp.lt.s32.totalorder %s28_s24, %s28_s24 }
  0x1b   :  { %p150_p11 = scmp.ne.s32.totalorder %s28_s24, %s149_s4  ;;  %p155_p13 = scmp.lt.s32.totalorder %s149_s4, %s149_s4 }
  0x1d   :  { %p156_p0 = por %p155_p13, %p154_p12 }
  0x1f   :  { %p157_p1 = pnand %p156_p0, %p150_p11 }
  0x21   :  { %160 = shalt.err (!%p157_p1)
}
  0x22   :  { %33 = dma.hbm_to_vmem [thread:$0]  %s248_s1, 1024, %s28_s24, [#allocation6], %s190_s19, %s190_s19, %s191_s20  }
  0x23   :  { %183 = dma.done.wait [#allocation3], 1024  }
  0x24   :  { %184 = vsyncadd [#allocation3], 4294966272 }
  0x25   :  { %185 = dma.done.wait [#allocation6], 1024  }
  0x26   :  { %186 = vsyncadd [#allocation6], 4294966272  ;;  %v44_v0 = vld [vmem:[#allocation2 + $0x20] sm:$0xff]  ;;  %v45_v1 = vld [vmem:[#allocation2 + $0x28] sm:$0xff]  ;;  %s193_s1 = smov [#allocation7]  }
  0x27   :  { %v52_v2 = vld [vmem:[#allocation5 + $0x20] sm:$0xff]  ;;  %v53_v3 = vld [vmem:[#allocation5 + $0x28] sm:$0xff]  ;;  %v46_v10 = vld [vmem:[#allocation2 + $0x30] sm:$0xff]  ;;  %s97_s6 = sshll.u32 %s193_s1, 4  ;;  %s98_s6 = int_to_ptr.vmem [resolvable:$true] %s97_s6 }
  0x28   :  { %v60_v4 = vsub.f32 %v44_v0, %v52_v2  ;;  %v40_v5 = vld [vmem:[#allocation2] sm:$0xff]  ;;  %v41_v6 = vld [vmem:[#allocation2 + $0x8] sm:$0xff]  ;;  %v61_v7 = vsub.f32 %v45_v1, %v53_v3  ;;  %v47_v14 = vld [vmem:[#allocation2 + $0x38] sm:$0xff]  ;;  %s161_s7 = scalar_lea.vmem %s98_s6, 512  ;;  %p166_p3 = scmp.lt.s32.totalorder %s98_s6, %s98_s6 }
  0x29   :  { %v48_v8 = vld [vmem:[#allocation5] sm:$0xff]  ;;  %v49_v9 = vld [vmem:[#allocation5 + $0x8] sm:$0xff]  ;;  %v54_v15 = vld [vmem:[#allocation5 + $0x30] sm:$0xff]  ;;  %p162_p2 = scmp.ne.s32.totalorder %s98_s6, %s161_s7  ;;  %p167_p4 = scmp.lt.s32.totalorder %s161_s7, %s161_s7 }
  0x2a   :  { %v68_v11 = vmul.f32 %v60_v4, %v60_v4  ;;  %v56_v12 = vsub.f32 %v40_v5, %v48_v8  ;;  %v57_v13 = vsub.f32 %v41_v6, %v49_v9  ;;  %v55_v16 = vld [vmem:[#allocation5 + $0x38] sm:$0xff]  ;;  %v69_v17 = vmul.f32 %v61_v7, %v61_v7  ;;  %v42_v20 = vld [vmem:[#allocation2 + $0x10] sm:$0xff] }
  0x2b   :  { %v62_v18 = vsub.f32 %v46_v10, %v54_v15  ;;  %v63_v19 = vsub.f32 %v47_v14, %v55_v16  ;;  %v43_v21 = vld [vmem:[#allocation2 + $0x18] sm:$0xff]  ;;  %v50_v22 = vld [vmem:[#allocation5 + $0x10] sm:$0xff]  ;;  %p168_p5 = por %p167_p4, %p166_p3 }
  0x2c   :  { %v64_v23 = vmul.f32 %v56_v12, %v56_v12  ;;  %v65_v24 = vmul.f32 %v57_v13, %v57_v13  ;;  %v51_v25 = vld [vmem:[#allocation5 + $0x18] sm:$0xff]  ;;  %v58_v26 = vsub.f32 %v42_v20, %v50_v22  ;;  %v78_v27 = vadd.f32 %v69_v17, %v68_v11 }
  0x2d   :  { %v70_v28 = vmul.f32 %v62_v18, %v62_v18  ;;  %v71_v29 = vmul.f32 %v63_v19, %v63_v19  ;;  %v59_v30 = vsub.f32 %v43_v21, %v51_v25  ;;  %p169_p6 = pnand %p168_p5, %p162_p2 }
  0x2e   :  { %v72_v31 = vadd.f32 %v65_v24, %v64_v23  ;;  %v66_v32 = vmul.f32 %v58_v26, %v58_v26  ;;  %79 = vadd.xlane.f32.xlu1 %v78_v27 }
  0x2f   :  { %v81_v33 = vadd.f32 %v71_v29, %v70_v28  ;;  %v67_v34 = vmul.f32 %v59_v30, %v59_v30 }
  0x30   :  { %73 = vadd.xlane.f32.xlu0 %v72_v31 }
  0x31   :  { %v75_v35 = vadd.f32 %v67_v34, %v66_v32 }
  0x32   :  { %82 = vadd.xlane.f32.xlu1 %v81_v33 }
  0x34   :  { %76 = vadd.xlane.f32.xlu0 %v75_v35 }
  0xbb   :  { %v80_v36 = vpop.xlane.xlu1 %79 }
  0xbc   :  { %v86_v37 = vmul.f32 0.001953125, %v80_v36 }
  0xbd   :  { %v74_v38 = vpop.xlane.xlu0 %73 }
  0xbe   :  { %v84_v39 = vmul.f32 0.001953125, %v74_v38  ;;  %90 = vst [vmem:[#allocation7 + $0x10] sm:$0xff] %v86_v37 }
  0xbf   :  { %v83_v40 = vpop.xlane.xlu1 %82 }
  0xc0   :  { %88 = vst [vmem:[#allocation7] sm:$0xff] %v84_v39  ;;  %v87_v41 = vmul.f32 0.001953125, %v83_v40 }
  0xc1   :  { %v77_v42 = vpop.xlane.xlu0 %76 }
  0xc2   :  { %v85_v43 = vmul.f32 0.001953125, %v77_v42  ;;  %91 = vst [vmem:[#allocation7 + $0x18] sm:$0xff] %v87_v41 }
  0xc4   :  { %89 = vst [vmem:[#allocation7 + $0x8] sm:$0xff] %v85_v43 }
  0xc5   :  { %172 = shalt.err (!%p169_p6)
}
  0xc6   :  { %s173_s10 = scalar_lea.hbm %s249_s2, 512 }
  0xc7   :  { %p174_p7 = scmp.ne.s32.totalorder %s249_s2, %s173_s10  ;;  %p177_p8 = scmp.lt.u32.totalorder %s173_s10, %s249_s2 }
  0xc9   :  { %p179_p9 = pnand %p177_p8, %p174_p7 }
  0xcb   :  { %182 = shalt.err (!%p179_p9)
}
  0xcc   :  { %s194_s15 = smov 128   ;;  %s195_s16 = smov 8  }
  0xcd   :  { %103 = dma.vmem_to_hbm [thread:$0]  %s98_s6, 512, %s249_s2, [#allocation4], %s194_s15, %s194_s15, %s195_s16  }
  0xce   :  { %187 = dma.done.wait [#allocation4], 512  }
  0xcf   :  { %188 = vsyncadd [#allocation4], 4294966784 }
  0xd0   :  { %107 = vsyncpa [#allocation3], 1 }
  0xd1   :  { %108 = vsyncpa [#allocation6], 1 }
  0xd2   :  { %109 = vsyncpa [#allocation4], 1 }

</bundles_post_ra>
